<compile_context>
chip_gen: v7x
topology: tpu7x:2x2x1
jax: 0.10.0
libtpu: 0.0.40
codegen_flags: <defaults>
</compile_context>

<pallas_src>
import jax
import jax.numpy as jnp
from jax.experimental import pallas as pl
from jax.experimental.pallas import tpu as pltpu

_LANE = 128
_VMEM_BUDGET = 40 * 1024 * 1024      # conservative: fits v7x's 64 MiB VMEM
_VMEM_LIMIT = 64 * 1024 * 1024
_TINY_ELEMS = 256 * 256 * 256        # below this M*N*K, XLA's matmul wins


# ---------------------------------------------------------------------------
# Kernels
# ---------------------------------------------------------------------------
def _matmul_kernel_full_k(a_ref, b_ref, o_ref):
    """Whole K dimension resident in VMEM: single MXU pass, no accumulator."""
    o_ref[...] = jnp.dot(
        a_ref[...], b_ref[...], preferred_element_type=jnp.float32
    ).astype(o_ref.dtype)


def _matmul_kernel_acc_out(a_ref, b_ref, o_ref):
    """Split-K, f32 output: accumulate directly into the resident output block
    (its index_map ignores k), saving the f32 scratch and the final copy."""
    @pl.when(pl.program_id(2) == 0)
    def _():
        o_ref[...] = jnp.zeros_like(o_ref)

    o_ref[...] += jnp.dot(
        a_ref[...], b_ref[...], preferred_element_type=jnp.float32
    )


def _matmul_kernel_scratch(a_ref, b_ref, o_ref, acc_ref):
    """Split-K, non-f32 output: classic f32 VMEM accumulator."""
    @pl.when(pl.program_id(2) == 0)
    def _():
        acc_ref[...] = jnp.zeros_like(acc_ref)

    acc_ref[...] += jnp.dot(
        a_ref[...], b_ref[...], preferred_element_type=jnp.float32
    )

    @pl.when(pl.program_id(2) == pl.num_programs(2) - 1)
    def _():
        o_ref[...] = acc_ref[...].astype(o_ref.dtype)


# ---------------------------------------------------------------------------
# Tiling helpers
# ---------------------------------------------------------------------------
def _round_up(x, m):
    return (x + m - 1) // m * m


def _pick_tile(dim, candidates):
    for c in candidates:
        if dim % c == 0:
            return c
    return _LANE


def _pallas_matmul(a, b):
    """Assumes M, K, N are all multiples of 128."""
    M, K = a.shape
    _, N = b.shape
    out_dtype = jnp.result_type(a.dtype, b.dtype)
    in_bytes = max(a.dtype.itemsize, b.dtype.itemsize)
    out_bytes = jnp.dtype(out_dtype).itemsize

    # --- tm / tn: big lane-dense output tiles, but keep >= 2 parallel tiles
    tm = _pick_tile(M, (512, 256, 128))
    tn = _pick_tile(N, (512, 256, 128))
    while (M // tm) * (N // tn) < 2 and max(tm, tn) > _LANE:
        if tn >= tm and tn > _LANE:
            tn //= 2
        else:
            tm //= 2

    # --- tk: full K if the (double-buffered) working set fits VMEM budget
    def working_set(tk_, use_acc):
        ws = 2 * (tm * tk_ + tk_ * tn) * in_bytes + 2 * tm * tn * out_bytes
        if use_acc:
            ws += tm * tn * 4
        return ws

    use_scratch = out_dtype != jnp.float32
    if working_set(K, False) <= _VMEM_BUDGET:
        tk = K
    else:
        tk = _LANE
        for c in (2048, 1024, 512, 256, 128):
            if K % c == 0 and working_set(c, use_scratch) <= _VMEM_BUDGET:
                tk = c
                break

    cost = pl.CostEstimate(
        flops=2 * M * N * K,
        transcendentals=0,
        bytes_accessed=in_bytes * (M * K + K * N) + out_bytes * M * N,
    )

    if tk == K:
        # Single reduction step: no k grid axis, no accumulator at all.
        cparams = pltpu.CompilerParams(
            dimension_semantics=("parallel", "parallel"),
            vmem_limit_bytes=_VMEM_LIMIT,
        )
        return pl.pallas_call(
            _matmul_kernel_full_k,
            out_shape=jax.ShapeDtypeStruct((M, N), out_dtype),
            grid_spec=pltpu.PrefetchScalarGridSpec(
                num_scalar_prefetch=0,
                grid=(M // tm, N // tn),
                in_specs=[
                    pl.BlockSpec((tm, K), lambda i, j: (i, 0)),
                    pl.BlockSpec((K, tn), lambda i, j: (0, j)),
                ],
                out_specs=pl.BlockSpec((tm, tn), lambda i, j: (i, j)),
            ),
            compiler_params=cparams,
            cost_estimate=cost,
        )(a, b)

    # Split-K path.
    cparams = pltpu.CompilerParams(
        dimension_semantics=("parallel", "parallel", "arbitrary"),
        vmem_limit_bytes=_VMEM_LIMIT,
    )
    if use_scratch:
        kernel = _matmul_kernel_scratch
        scratch = [pltpu.VMEM((tm, tn), jnp.float32)]
    else:
        kernel = _matmul_kernel_acc_out
        scratch = []

    return pl.pallas_call(
        kernel,
        out_shape=jax.ShapeDtypeStruct((M, N), out_dtype),
        grid_spec=pltpu.PrefetchScalarGridSpec(
            num_scalar_prefetch=0,
            grid=(M // tm, N // tn, K // tk),
            in_specs=[
                pl.BlockSpec((tm, tk), lambda i, j, k: (i, k)),
                pl.BlockSpec((tk, tn), lambda i, j, k: (k, j)),
            ],
            out_specs=pl.BlockSpec((tm, tn), lambda i, j, k: (i, j)),
            scratch_shapes=scratch,
        ),
        compiler_params=cparams,
        cost_estimate=cost,
    )(a, b)


# ---------------------------------------------------------------------------
# Public forward (== CustomPythonOp.forward(A, B) = A @ B)
# ---------------------------------------------------------------------------
def custom_op_forward(a: jax.Array, b: jax.Array) -> jax.Array:
    M, K = a.shape
    K2, N = b.shape
    assert K == K2, "inner dimensions must match"

    # Tiny / sub-tile problems: kernel-launch + per-step pipeline overhead
    # dominates, so hand them to XLA's stock matmul.
    if min(M, K, N) < _LANE or M * N * K < _TINY_ELEMS:
        return jnp.dot(a, b)

    # Zero-pad to 128-multiples so the Pallas tiling always applies.
    Mp, Kp, Np = _round_up(M, _LANE), _round_up(K, _LANE), _round_up(N, _LANE)
    a_p = a if (Mp == M and Kp == K) else jnp.pad(a, ((0, Mp - M), (0, Kp - K)))
    b_p = b if (Kp == K and Np == N) else jnp.pad(b, ((0, Kp - K), (0, Np - N)))

    out = _pallas_matmul(a_p, b_p)
    if (Mp, Np) != (M, N):
        out = out[:M, :N]
    return out


if __name__ == "__main__":
    key = jax.random.PRNGKey(0)
    k_a, k_b, k_c, k_d = jax.random.split(key, 4)

    # Small but tile-aligned shapes: exercises the full-K Pallas path.
    M, K, N = 256, 512, 256
    a = jax.random.normal(k_a, (M, K), dtype=jnp.float32)
    b = jax.random.normal(k_b, (K, N), dtype=jnp.float32)
    out = jax.block_until_ready(custom_op_forward(a, b))
    ref = a @ b
    assert out.shape == ref.shape and out.dtype == ref.dtype
    assert jnp.allclose(out, ref, atol=1e-3, rtol=1e-3)

    # Non-128-aligned shapes: exercises the pad + slice path.
    M2, K2_, N2 = 300, 512, 200
    a2 = jax.random.normal(k_c, (M2, K2_), dtype=jnp.float32)
    b2 = jax.random.normal(k_d, (K2_, N2), dtype=jnp.float32)
    out2 = jax.block_until_ready(custom_op_forward(a2, b2))
    ref2 = a2 @ b2
    assert out2.shape == ref2.shape
    assert jnp.allclose(out2, ref2, atol=1e-3, rtol=1e-3)

    print("KERNEL_OK")
</pallas_src>

<mosaic_0001>
module attributes {stable_mosaic.version = 11 : i64} {
  func.func @_matmul_kernel_full_k(%arg0: i32, %arg1: i32, %arg2: memref<256x512xf32, #tpu.memory_space<vmem>>, %arg3: memref<512x128xf32, #tpu.memory_space<vmem>>, %arg4: memref<256x128xf32, #tpu.memory_space<vmem>>) attributes {dimension_semantics = [#tpu.dimension_semantics<parallel>, #tpu.dimension_semantics<parallel>], iteration_bounds = array<i64: 1, 2>, scalar_prefetch = 0 : i64, scratch_operands = 0 : i64, tpu.core_type = #tpu.core_type<tc>, window_params = [{transform_indices = @transform_0, window_bounds = array<i64: 256, 512>}, {transform_indices = @transform_1, window_bounds = array<i64: 512, 128>}, {transform_indices = @transform_2, window_bounds = array<i64: 256, 128>}]} {
    %c0 = arith.constant 0 : index
    %c0_0 = arith.constant 0 : index
    %0 = vector.load %arg2[%c0, %c0_0] : memref<256x512xf32, #tpu.memory_space<vmem>>, vector<256x512xf32>
    %c0_1 = arith.constant 0 : index
    %c0_2 = arith.constant 0 : index
    %1 = vector.load %arg3[%c0_1, %c0_2] : memref<512x128xf32, #tpu.memory_space<vmem>>, vector<512x128xf32>
    %cst = arith.constant dense<0.000000e+00> : vector<256x128xf32>
    %2 = tpu.matmul %0, %1, %cst {dimension_numbers = #tpu.dot_dimension_numbers<[1], [0], [0], [1], [0, 0, 1, 1], [], []>} : vector<256x512xf32>, vector<512x128xf32>, vector<256x128xf32> -> vector<256x128xf32>
    %c0_3 = arith.constant 0 : index
    %c0_4 = arith.constant 0 : index
    %3 = vector.load %arg4[%c0_3, %c0_4] : memref<256x128xf32, #tpu.memory_space<vmem>>, vector<256x128xf32>
    tpu.vector_store %arg4[%c0_3, %c0_4], %2 {strides = array<i32>} : memref<256x128xf32, #tpu.memory_space<vmem>>, vector<256x128xf32>,
    return
  }
  func.func @transform_0(%arg0: i32, %arg1: i32) -> (i32, i32) {
    %c0_i32 = arith.constant 0 : i32
    %c0_i32_0 = arith.constant 0 : i32
    return %arg0, %c0_i32 : i32, i32
  }
  func.func @transform_1(%arg0: i32, %arg1: i32) -> (i32, i32) {
    %c0_i32 = arith.constant 0 : i32
    %c0_i32_0 = arith.constant 0 : i32
    return %c0_i32, %arg1 : i32, i32
  }
  func.func @transform_2(%arg0: i32, %arg1: i32) -> (i32, i32) {
    %c0_i32 = arith.constant 0 : i32
    return %arg0, %arg1 : i32, i32
  }
}

</mosaic_0001>

<bundles_post_ra>
// kernel: tpu_custom_call.1
= control target key start
LH: loop header
LB: loop body
LE: loop exit
PB: predicated region body
PF: predicated region fallthrough
CT: control target
= control target key end

     0   :  { %7 = vsyncpa [#allocation3], 0  ;;  %s1740_s0 = inlined_call_operand.hbm [shape: f32[256,512], index: 0, kind: input, shape index: {}]   ;;  %s1741_s1 = inlined_call_operand.hbm [shape: f32[512,256], index: 1, kind: input, shape index: {}]   ;;  %s1742_s2 = inlined_call_operand.hbm [shape: f32[256,256], index: 2, kind: output, shape index: {}]  }
   0x1   :  { %8 = vsyncpa [#allocation6], 0 }
   0x2   :  { %10 = vsyncpa [#allocation6 + $0x1], 0 }
   0x3   :  { %11 = vsyncpa [#allocation4], 0 }
   0x4   :  { %13 = vsyncpa [#allocation4 + $0x1], 0  ;;  %s1386_s9 = smov 0   ;;  %s1388_s10 = smov 0  }
   0x5   :  { %s1390_s11 = smov 0   ;;  %s1392_s12 = smov 0  }
   0x6   :  { %s1394_s13 = smov 0   ;;  %s1396_s14 = smov 0  }
   0x7 LB: > { %s988_s15 = sadd.s32 4294967295, %s1357_s14   ;;  %s989_s16 = sadd.s32 4294967294, %s1357_s14   ;;  %s1357_s14 = sphi %s1396_s14, %s19_s14   ;;  %s1353_s13 = sphi %s1394_s13, %s1768_s13   ;;  %s1349_s12 = sphi %s1392_s12, %s1767_s12   ;;  %s1345_s11 = sphi %s1390_s11, %s1766_s11   ;;  %s1341_s10 = sphi %s1388_s10, %s1765_s10   ;;  %s1337_s9 = sphi %s1386_s9, %s1764_s9  }
   0x8   : > { %p71_p0 = scmp.ne.s32.totalorder %s1345_s11, %s1341_s10  ;;  %p72_p1 = scmp.eq.s32.totalorder %s1357_s14, 0 }
   0x9   : > { %p77_p2 = scmp.ne.s32.totalorder %s1341_s10, %s1337_s9  ;;  %p1423_p3 = scmp.eq.s32.totalorder %s988_s15, 0 }
   0xa   : > { %p1427_p4 = por %p72_p1, %p71_p0  ;;  %p103_p5 = scmp.eq.s32.totalorder %s988_s15, 1 }
   0xb   : > { %s1749_s17 = scalar_select %p1423_p3, 1, 0 }
   0xc   : > { %p1433_p6 = por %p1423_p3, %p77_p2  ;;  %p109_p7 = scmp.eq.s32.totalorder %s989_s16, 1 }
   0xd   : > { %p1437_p8 = por %p103_p5, %p71_p0  ;;  %p990_p9 = scmp.ge.s32.totalorder %s1357_s14, 1 }
   0xe   : > { %s1751_s19 = scalar_select %p1433_p6, 1, 0 }
   0xf   : > { %s1752_s20 = scalar_select %p1437_p8, 1, 0 }
  0x10   : > { %p1442_p10 = por %p109_p7, %p77_p2  ;;  %p116_p11 = scmp.lt.s32.totalorder %s1357_s14, 3 }
  0x11   : > { %s1359_s23 = smov [#allocation2]   ;;  %p1152_p1 = scmp.lt.s32.totalorder %s1357_s14, 2 }
  0x12   : > { %s1753_s21 = scalar_select %p1442_p10, 1, 0 }
  0x13   : > { %p1447_p12 = pnand %p990_p9, %p116_p11  ;;  %s132_s24 = sshll.u32 %s1359_s23, 4  ;;  %s1451_s24 = int_to_ptr.vmem [resolvable:$true] %s132_s24 }
  0x14   : > { %p1465_p2 = pnand %p1152_p1, %p1427_p4  ;;  %s28_s27 = sadd.s32 1, %s1353_s13 }
  0x15   : > { %s1754_s22 = scalar_select %p1447_p12, 1, 0 }
  0x16   : > { %p1139_p13 = pneg %p1447_p12  ;;  %s1213_s30 = scalar_lea.hbm %s1740_s0, 16384 }
  0x17   : > { %s1756_s26 = scalar_select %p1465_p2, 1, 0 }
  0x18   : > { %p1459_p5 = pnand %p1139_p13, %p1423_p3  ;;  %p1214_p7 = scmp.ne.s32.totalorder %s1740_s0, %s1213_s30 }
  0x19   : > { %p1220_p4 = scmp.lt.u32.totalorder %s1213_s30, %s1740_s0 }
  0x1a   : > { %p1215_p9 = pneg %p1459_p5 }
  0x1c   : > { %p1216_p11 = pnand %p1215_p9, %p1214_p7 }
  0x1e   : > { %p1217_p13 = pneg %p1216_p11 }
  0x20   : > { %p1222_p1 = pnand %p1220_p4, %p1217_p13 }
  0x22   : > { %1225 = shalt.err (!%p1222_p1)
}
  0x23   : > { %s1226_s7 = scalar_lea.vmem %s1451_s24, 16384  ;;  %p1234_p6 = scmp.lt.s32.totalorder %s1451_s24, %s1451_s24 }
  0x24   : > { %p1227_p0 = scmp.ne.s32.totalorder %s1451_s24, %s1226_s7  ;;  %p1235_p3 = scmp.lt.s32.totalorder %s1226_s7, %s1226_s7 }
  0x26   : > { %p1229_p10 = pnand %p1227_p0, %p1215_p9  ;;  %p1236_p12 = por %p1235_p3, %p1234_p6 }
  0x28   : > { %p1230_p8 = pneg %p1229_p10 }
  0x2a   : > { %p1237_p2 = pnand %p1236_p12, %p1230_p8 }
  0x2c   : > { %1240 = shalt.err (!%p1237_p2)
}
  0x2d   : > { %s1360_s8 = smov 512   ;;  %s1361_s15 = smov 32  }
  0x2e   : > { %1142 = dma.hbm_to_vmem [thread:$0]  (!%p1459_p5), %s1740_s0, 16384, %s1451_s24, [#allocation3], %s1360_s8, %s1360_s8, %s1361_s15  }
  0x2f   : > { %p29_p10 = scmp.ge.s32.totalorder %s28_s27, 2  ;;  %s64_s23 = sadd.s32 1, %s1345_s11 }
  0x30   : > { %s146_s28 = sand.u32 1, %s1345_s11   ;;  %s994_s3 = sshll.u32 %s1353_s13, 7 }
  0x31   : > { %s1770_s27 = smov (%p29_p10, %s28_s27), 0  ;;  %s993_s29 = sshll.u32 %s146_s28, 9 }
  0x32   : > { %s61_s30 = ssub.s32 %s1353_s13, %s1770_s27  ;;  %s1501_s25 = scalar_lea.hbm %s1741_s1, %s994_s3 }
  0x33   : > { %p62_p3 = scmp.eq.s32.totalorder %s61_s30, 0  ;;  %s150_s24 = scalar_lea.vmem [#allocation5], %s993_s29 }
  0x34   : > { %s156_s6 = sshll.u32 %s150_s24, 4  ;;  %s1508_s8 = scalar_lea.sflag [#allocation6], %s146_s28  ;;  %s1506_s6 = int_to_ptr.vmem [resolvable:$true] %s156_s6 }
  0x35   : > { %s1504_s7 = scalar_select %p62_p3, %s1345_s11, %s64_s23  }
  0x36   : > { %s1241_s15 = scalar_lea.hbm %s1501_s25, 8192  ;;  %p1757_p8 = scmp.ne.s32.totalorder %s1756_s26, 0 }
  0x37   : > { %p1242_p6 = scmp.ne.s32.totalorder %s1501_s25, %s1241_s15  ;;  %s1246_s30 = scalar_lea.hbm %s1741_s1, 16384 }
  0x38   : > { %p1243_p12 = pneg %p1757_p8  ;;  %p1247_p2 = scmp.lt.u32.totalorder %s1501_s25, %s1741_s1 }
  0x39   : > { %p1248_p7 = scmp.lt.u32.totalorder %s1246_s30, %s1241_s15  ;;  %p1250_p11 = scmp.lt.u32.totalorder %s1241_s15, %s1501_s25 }
  0x3a   : > { %p1244_p0 = pnand %p1243_p12, %p1242_p6 }
  0x3b   : > { %p1249_p9 = por %p1248_p7, %p1247_p2 }
  0x3c   : > { %p1245_p5 = pneg %p1244_p0 }
  0x3d   : > { %p1251_p13 = por %p1250_p11, %p1249_p9 }
  0x3f   : > { %p1252_p4 = pnand %p1251_p13, %p1245_p5 }
  0x41   : > { %1255 = shalt.err (!%p1252_p4)
}
  0x42   : > { %s1256_s23 = scalar_lea.vmem %s1506_s6, 8192  ;;  %s1362_s28 = smov [#allocation5]  }
  0x43   : > { %p1257_p1 = scmp.ne.s32.totalorder %s1506_s6, %s1256_s23  ;;  %s1261_s4 = sshll.u32 %s1362_s28, 4  ;;  %s1262_s4 = int_to_ptr.vmem [resolvable:$false] %s1261_s4 }
  0x44   : > { %s1263_s5 = scalar_lea.vmem %s1262_s4, 16384  ;;  %p1264_p6 = scmp.lt.s32.totalorder %s1506_s6, %s1262_s4 }
  0x45   : > { %p1259_p10 = pnand %p1257_p1, %p1243_p12  ;;  %p1265_p0 = scmp.lt.s32.totalorder %s1263_s5, %s1256_s23 }
  0x47   : > { %p1260_p3 = pneg %p1259_p10  ;;  %p1266_p2 = por %p1265_p0, %p1264_p6 }
  0x49   : > { %p1267_p7 = pnand %p1266_p2, %p1260_p3 }
  0x4b   : > { %1270 = shalt.err (!%p1267_p7)
}
  0x4c   : > { %s1363_s24 = smov 256   ;;  %s1364_s15 = smov 128  }
  0x4d   : > { %s1365_s16 = smov 8   ;;  %p1758_p12 = scmp.ne.s32.totalorder %s1754_s22, 0 }
  0x4e   : > { %1146 = dma.hbm_to_vmem [thread:$0]  (!%p1757_p8), %s1501_s25, 8192, %s1506_s6, %s1508_s8, %s1363_s24, %s1364_s15, %s1365_s16  }
  0x4f   : > { %168 = sbr.rel (%p1758_p12) target bundleno = 512 (0x200), region = 28  ;;  %p1759_p5 = scmp.ne.s32.totalorder (!%p1758_p12), %s1749_s17, 0 }
  0x56   : > { %1324 = dma.done.wait (%p1759_p5), [#allocation3], 16384  }
  0x57   : > { %1326 = vsyncadd (%p1759_p5), [#allocation3], 4294950912  ;;  %s1543_s18 = sand.u32 1, %s1341_s10   ;;  %p1760_p8 = scmp.ne.s32.totalorder %s1751_s19, 0 }
  0x58   : > { %s997_s30 = sshll.u32 %s1543_s18, 9  ;;  %s175_s29 = scalar_lea.sflag [#allocation6], %s1543_s18 }
  0x59   : > { %s1547_s3 = scalar_lea.vmem [#allocation5], %s997_s30 }
  0x5a   : > { %1328 = dma.done.wait (%p1760_p8), %s175_s29, 8192  }
  0x5b   : > { %1330 = vsyncadd (%p1760_p8), %s175_s29, 4294959104  ;;  %v1366_v0 = vmov 0.0|0.0   ;;  %v329_v1 = vld [vmem:[%s1547_s3] sm:$0xff]  ;;  %v330_v2 = vld [vmem:[%s1547_s3 + $0x8] sm:$0xff]  ;;  %s998_s17 = sshll.u32 %s1543_s18, 8  ;;  %s1000_s22 = sshll.u32 %s1349_s12, 7 }
  0x5c   : > { %1003 = vmatprep.subr.bf16.mxu1 %v1366_v0  ;;  %1051 = vmatprep.subr.bf16.mxu0 %v1366_v0  ;;  %v361_v3 = vld [vmem:[%s1547_s3 + $0x100] sm:$0xff]  ;;  %v1004_v4 = vpack.c.bf16 %v330_v2, %v329_v1  ;;  %v362_v5 = vld [vmem:[%s1547_s3 + $0x108] sm:$0xff]  ;;  %v331_v6 = vld [vmem:[%s1547_s3 + $0x10] sm:$0xff]  ;;  %s1650_s19 = scalar_lea.vmem [#allocation7], %s998_s17  ;;  %s1688_s8 = scalar_lea.hbm %s1742_s2, %s1000_s22 }
  0x5d   : > { %v332_v7 = vld [vmem:[%s1547_s3 + $0x18] sm:$0xff]  ;;  %v1052_v8 = vpack.c.bf16 %v362_v5, %v361_v3  ;;  %v363_v9 = vld [vmem:[%s1547_s3 + $0x110] sm:$0xff]  ;;  %v333_v13 = vld [vmem:[%s1547_s3 + $0x20] sm:$0xff]  ;;  %s891_s26 = sshll.u32 %s1650_s19, 4  ;;  %s876_s12 = scalar_lea.sflag [#allocation4], %s1543_s18  ;;  %s1690_s26 = int_to_ptr.vmem [resolvable:$true] %s891_s26 }
  0x5e   : > { %v364_v10 = vld [vmem:[%s1547_s3 + $0x118] sm:$0xff]  ;;  %1005 = vmatpush1.bf16.msra.mxu1 %v1004_v4  ;;  %v1007_v11 = vpack.c.bf16 %v332_v7, %v331_v6  ;;  %v334_v14 = vld [vmem:[%s1547_s3 + $0x28] sm:$0xff]  ;;  %v365_v15 = vld [vmem:[%s1547_s3 + $0x120] sm:$0xff]  ;;  %s1271_s23 = scalar_lea.vmem %s1690_s26, 4096  ;;  %p1761_p11 = scmp.ne.s32.totalorder %s1752_s20, 0 }
  0x5f   : > { %1053 = vmatpush1.bf16.msra.mxu0 %v1052_v8  ;;  %1006 = vmatprep.subr.bf16.mxu1 %v1366_v0  ;;  %v1055_v12 = vpack.c.bf16 %v364_v10, %v363_v9  ;;  %v366_v16 = vld [vmem:[%s1547_s3 + $0x128] sm:$0xff]  ;;  %v1010_v17 = vpack.c.bf16 %v334_v14, %v333_v13  ;;  %v335_v19 = vld [vmem:[%s1547_s3 + $0x30] sm:$0xff]  ;;  %v336_v20 = vld [vmem:[%s1547_s3 + $0x38] sm:$0xff]  ;;  %p1272_p9 = scmp.ne.s32.totalorder %s1690_s26, %s1271_s23  ;;  %s1367_s28 = smov [#allocation7]  }
  0x60   : > { %1054 = vmatprep.subr.bf16.mxu0 %v1366_v0  ;;  %v1058_v18 = vpack.c.bf16 %v366_v16, %v365_v15  ;;  %v367_v21 = vld [vmem:[%s1547_s3 + $0x130] sm:$0xff]  ;;  %v368_v22 = vld [vmem:[%s1547_s3 + $0x138] sm:$0xff]  ;;  %v1013_v23 = vpack.c.bf16 %v336_v20, %v335_v19  ;;  %v337_v25 = vld [vmem:[%s1547_s3 + $0x40] sm:$0xff]  ;;  %s1275_s4 = sshll.u32 %s1367_s28, 4  ;;  %s1276_s4 = int_to_ptr.vmem [resolvable:$false] %s1275_s4 }
  0x61   : > { %v1061_v24 = vpack.c.bf16 %v368_v22, %v367_v21  ;;  %v338_v26 = vld [vmem:[%s1547_s3 + $0x48] sm:$0xff]  ;;  %v369_v27 = vld [vmem:[%s1547_s3 + $0x140] sm:$0xff]  ;;  %v339_v31 = vld [vmem:[%s1547_s3 + $0x50] sm:$0xff]  ;;  %p1273_p13 = pnand %p1272_p9, %p1761_p11  ;;  %s1277_s5 = scalar_lea.vmem %s1276_s4, 8192 }
  0x62   : > { %1008 = vmatpush1.bf16.msra.mxu1 %v1007_v11  ;;  %v370_v28 = vld [vmem:[%s1547_s3 + $0x148] sm:$0xff]  ;;  %v1016_v29 = vpack.c.bf16 %v338_v26, %v337_v25  ;;  %v340_v32 = vld [vmem:[%s1547_s3 + $0x58] sm:$0xff]  ;;  %v371_v33 = vld [vmem:[%s1547_s3 + $0x150] sm:$0xff]  ;;  %p1278_p1 = scmp.lt.s32.totalorder %s1690_s26, %s1276_s4  ;;  %p1279_p10 = scmp.lt.s32.totalorder %s1277_s5, %s1271_s23 }
  0x63   : > { %1056 = vmatpush1.bf16.msra.mxu0 %v1055_v12  ;;  %1009 = vmatprep.subr.bf16.mxu1 %v1366_v0  ;;  %v1064_v30 = vpack.c.bf16 %v370_v28, %v369_v27  ;;  %v372_v34 = vld [vmem:[%s1547_s3 + $0x158] sm:$0xff]  ;;  %v1019_v35 = vpack.c.bf16 %v340_v32, %v339_v31  ;;  %v341_v37 = vld [vmem:[%s1547_s3 + $0x60] sm:$0xff]  ;;  %v342_v38 = vld [vmem:[%s1547_s3 + $0x68] sm:$0xff]  ;;  %p1274_p4 = pneg %p1273_p13 }
  0x64   : > { %1057 = vmatprep.subr.bf16.mxu0 %v1366_v0  ;;  %v1067_v36 = vpack.c.bf16 %v372_v34, %v371_v33  ;;  %v373_v39 = vld [vmem:[%s1547_s3 + $0x160] sm:$0xff]  ;;  %v374_v40 = vld [vmem:[%s1547_s3 + $0x168] sm:$0xff]  ;;  %v204_v42 = vld [vmem:[#allocation2 + $0x18] sm:$0xff]  ;;  %v1022_v43 = vpack.c.bf16 %v342_v38, %v341_v37  ;;  %p1280_p3 = por %p1279_p10, %p1278_p1 }
  0x65   : > { %v202_v41 = vld [vmem:[#allocation2 + $0x8] sm:$0xff]  ;;  %682 = vmatprep.mubr.f32.mxu0 %v204_v42  ;;  %v1070_v44 = vpack.c.bf16 %v374_v40, %v373_v39  ;;  %v343_v45 = vld [vmem:[%s1547_s3 + $0x70] sm:$0xff]  ;;  %v344_v46 = vld [vmem:[%s1547_s3 + $0x78] sm:$0xff] }
  0x66   : > { %1011 = vmatpush1.bf16.msra.mxu1 %v1010_v17  ;;  %457 = vmatprep.mubr.f32.mxu1 %v202_v41  ;;  %v375_v47 = vld [vmem:[%s1547_s3 + $0x170] sm:$0xff]  ;;  %v376_v48 = vld [vmem:[%s1547_s3 + $0x178] sm:$0xff]  ;;  %v1025_v49 = vpack.c.bf16 %v344_v46, %v343_v45  ;;  %v345_v51 = vld [vmem:[%s1547_s3 + $0x80] sm:$0xff]  ;;  %p1281_p6 = pnand %p1280_p3, %p1274_p4 }
  0x67   : > { %1059 = vmatpush1.bf16.msra.mxu0 %v1058_v18  ;;  %1012 = vmatprep.subr.bf16.mxu1 %v1366_v0  ;;  %v1073_v50 = vpack.c.bf16 %v376_v48, %v375_v47  ;;  %v346_v52 = vld [vmem:[%s1547_s3 + $0x88] sm:$0xff]  ;;  %v377_v53 = vld [vmem:[%s1547_s3 + $0x180] sm:$0xff]  ;;  %v347_v57 = vld [vmem:[%s1547_s3 + $0x90] sm:$0xff] }
  0x68   : > { %1060 = vmatprep.subr.bf16.mxu0 %v1366_v0  ;;  %v378_v54 = vld [vmem:[%s1547_s3 + $0x188] sm:$0xff]  ;;  %v1028_v55 = vpack.c.bf16 %v346_v52, %v345_v51  ;;  %v348_v58 = vld [vmem:[%s1547_s3 + $0x98] sm:$0xff]  ;;  %v379_v59 = vld [vmem:[%s1547_s3 + $0x190] sm:$0xff] }
  0x69   : > { %v1076_v56 = vpack.c.bf16 %v378_v54, %v377_v53  ;;  %v380_v60 = vld [vmem:[%s1547_s3 + $0x198] sm:$0xff]  ;;  %v1031_v61 = vpack.c.bf16 %v348_v58, %v347_v57  ;;  %v349_v63 = vld [vmem:[%s1547_s3 + $0xa0] sm:$0xff]  ;;  %v350_v1 = vld [vmem:[%s1547_s3 + $0xa8] sm:$0xff] }
  0x6a   : > { %1014 = vmatpush1.bf16.msra.mxu1 %v1013_v23  ;;  %v1079_v62 = vpack.c.bf16 %v380_v60, %v379_v59  ;;  %v381_v2 = vld [vmem:[%s1547_s3 + $0x1a0] sm:$0xff]  ;;  %v382_v3 = vld [vmem:[%s1547_s3 + $0x1a8] sm:$0xff]  ;;  %v1034_v4 = vpack.c.bf16 %v350_v1, %v349_v63  ;;  %v351_v6 = vld [vmem:[%s1547_s3 + $0xb0] sm:$0xff] }
  0x6b   : > { %1062 = vmatpush1.bf16.msra.mxu0 %v1061_v24  ;;  %1015 = vmatprep.subr.bf16.mxu1 %v1366_v0  ;;  %v1082_v5 = vpack.c.bf16 %v382_v3, %v381_v2  ;;  %v352_v7 = vld [vmem:[%s1547_s3 + $0xb8] sm:$0xff]  ;;  %v383_v8 = vld [vmem:[%s1547_s3 + $0x1b0] sm:$0xff]  ;;  %v353_v12 = vld [vmem:[%s1547_s3 + $0xc0] sm:$0xff] }
  0x6c   : > { %1063 = vmatprep.subr.bf16.mxu0 %v1366_v0  ;;  %v384_v9 = vld [vmem:[%s1547_s3 + $0x1b8] sm:$0xff]  ;;  %v1037_v10 = vpack.c.bf16 %v352_v7, %v351_v6  ;;  %v354_v13 = vld [vmem:[%s1547_s3 + $0xc8] sm:$0xff]  ;;  %v385_v14 = vld [vmem:[%s1547_s3 + $0x1c0] sm:$0xff] }
  0x6d   : > { %v1085_v11 = vpack.c.bf16 %v384_v9, %v383_v8  ;;  %v386_v15 = vld [vmem:[%s1547_s3 + $0x1c8] sm:$0xff]  ;;  %v1040_v16 = vpack.c.bf16 %v354_v13, %v353_v12  ;;  %v355_v18 = vld [vmem:[%s1547_s3 + $0xd0] sm:$0xff]  ;;  %v356_v19 = vld [vmem:[%s1547_s3 + $0xd8] sm:$0xff] }
  0x6e   : > { %1017 = vmatpush1.bf16.msra.mxu1 %v1016_v29  ;;  %v1088_v17 = vpack.c.bf16 %v386_v15, %v385_v14  ;;  %v387_v20 = vld [vmem:[%s1547_s3 + $0x1d0] sm:$0xff]  ;;  %v388_v21 = vld [vmem:[%s1547_s3 + $0x1d8] sm:$0xff]  ;;  %v1043_v22 = vpack.c.bf16 %v356_v19, %v355_v18  ;;  %v357_v24 = vld [vmem:[%s1547_s3 + $0xe0] sm:$0xff] }
  0x6f   : > { %1065 = vmatpush1.bf16.msra.mxu0 %v1064_v30  ;;  %1018 = vmatprep.subr.bf16.mxu1 %v1366_v0  ;;  %v1091_v23 = vpack.c.bf16 %v388_v21, %v387_v20  ;;  %v358_v25 = vld [vmem:[%s1547_s3 + $0xe8] sm:$0xff]  ;;  %v389_v26 = vld [vmem:[%s1547_s3 + $0x1e0] sm:$0xff]  ;;  %v359_v30 = vld [vmem:[%s1547_s3 + $0xf0] sm:$0xff] }
  0x70   : > { %1066 = vmatprep.subr.bf16.mxu0 %v1366_v0  ;;  %v390_v27 = vld [vmem:[%s1547_s3 + $0x1e8] sm:$0xff]  ;;  %v1046_v28 = vpack.c.bf16 %v358_v25, %v357_v24  ;;  %v360_v31 = vld [vmem:[%s1547_s3 + $0xf8] sm:$0xff]  ;;  %v391_v32 = vld [vmem:[%s1547_s3 + $0x1f0] sm:$0xff] }
  0x71   : > { %v1094_v29 = vpack.c.bf16 %v390_v27, %v389_v26  ;;  %v392_v33 = vld [vmem:[%s1547_s3 + $0x1f8] sm:$0xff]  ;;  %v1049_v34 = vpack.c.bf16 %v360_v31, %v359_v30  ;;  %v203_v37 = vld [vmem:[#allocation2 + $0x10] sm:$0xff]  ;;  %v206_v38 = vld [vmem:[#allocation2 + $0x28] sm:$0xff] }
  0x72   : > { %1020 = vmatpush1.bf16.msra.mxu1 %v1019_v35  ;;  %v1097_v35 = vpack.c.bf16 %v392_v33, %v391_v32  ;;  %v208_v39 = vld [vmem:[#allocation2 + $0x38] sm:$0xff]  ;;  %v205_v40 = vld [vmem:[#allocation2 + $0x20] sm:$0xff]  ;;  %v207_v41 = vld [vmem:[#allocation2 + $0x30] sm:$0xff] }
  0x73   : > { %1068 = vmatpush1.bf16.msra.mxu0 %v1067_v36  ;;  %1021 = vmatprep.subr.bf16.mxu1 %v1366_v0  ;;  %v201_v36 = vld [vmem:[#allocation2] sm:$0xff]  ;;  %v210_v42 = vld [vmem:[#allocation2 + $0x48] sm:$0xff]  ;;  %v216_v46 = vld [vmem:[#allocation2 + $0x78] sm:$0xff] }
  0x74   : > { %1069 = vmatprep.subr.bf16.mxu0 %v1366_v0  ;;  %v214_v45 = vld [vmem:[#allocation2 + $0x68] sm:$0xff]  ;;  %v213_v47 = vld [vmem:[#allocation2 + $0x60] sm:$0xff]  ;;  %v215_v48 = vld [vmem:[#allocation2 + $0x70] sm:$0xff] }
  0x75   : > { %v217_v51 = vld [vmem:[#allocation2 + $0x80] sm:$0xff]  ;;  %v219_v52 = vld [vmem:[#allocation2 + $0x90] sm:$0xff]  ;;  %v222_v53 = vld [vmem:[#allocation2 + $0xa8] sm:$0xff] }
  0x76   : > { %1023 = vmatpush1.bf16.msra.mxu1 %v1022_v43  ;;  %v212_v43 = vld [vmem:[#allocation2 + $0x58] sm:$0xff]  ;;  %v226_v57 = vld [vmem:[#allocation2 + $0xc8] sm:$0xff]  ;;  %v225_v59 = vld [vmem:[#allocation2 + $0xc0] sm:$0xff] }
  0x77   : > { %1071 = vmatpush1.bf16.msra.mxu0 %v1070_v44  ;;  %1024 = vmatprep.subr.bf16.mxu1 %v1366_v0  ;;  %v209_v44 = vld [vmem:[#allocation2 + $0x40] sm:$0xff]  ;;  %v224_v54 = vld [vmem:[#allocation2 + $0xb8] sm:$0xff]  ;;  %v227_v60 = vld [vmem:[#allocation2 + $0xd0] sm:$0xff] }
  0x78   : > { %1072 = vmatprep.subr.bf16.mxu0 %v1366_v0  ;;  %v228_v58 = vld [vmem:[#allocation2 + $0xd8] sm:$0xff]  ;;  %v229_v63 = vld [vmem:[#allocation2 + $0xe0] sm:$0xff]  ;;  %v231_v1 = vld [vmem:[#allocation2 + $0xf0] sm:$0xff] }
  0x79   : > { %v234_v2 = vld [vmem:[#allocation2 + $0x108] sm:$0xff]  ;;  %v236_v3 = vld [vmem:[#allocation2 + $0x118] sm:$0xff]  ;;  %v237_v8 = vld [vmem:[#allocation2 + $0x120] sm:$0xff] }
  0x7a   : > { %1026 = vmatpush1.bf16.msra.mxu1 %v1025_v49  ;;  %v218_v49 = vld [vmem:[#allocation2 + $0x88] sm:$0xff]  ;;  %v240_v7 = vld [vmem:[#allocation2 + $0x138] sm:$0xff]  ;;  %v239_v9 = vld [vmem:[#allocation2 + $0x130] sm:$0xff] }
  0x7b   : > { %1074 = vmatpush1.bf16.msra.mxu0 %v1073_v50  ;;  %1027 = vmatprep.subr.bf16.mxu1 %v1366_v0  ;;  %v220_v50 = vld [vmem:[#allocation2 + $0x98] sm:$0xff]  ;;  %v238_v6 = vld [vmem:[#allocation2 + $0x128] sm:$0xff]  ;;  %v241_v12 = vld [vmem:[#allocation2 + $0x140] sm:$0xff] }
  0x7c   : > { %1075 = vmatprep.subr.bf16.mxu0 %v1366_v0  ;;  %v243_v13 = vld [vmem:[#allocation2 + $0x150] sm:$0xff]  ;;  %v246_v14 = vld [vmem:[#allocation2 + $0x168] sm:$0xff]  ;;  %v248_v15 = vld [vmem:[#allocation2 + $0x178] sm:$0xff] }
  0x7d   : > { %v250_v18 = vld [vmem:[#allocation2 + $0x188] sm:$0xff]  ;;  %v252_v19 = vld [vmem:[#allocation2 + $0x198] sm:$0xff]  ;;  %v249_v20 = vld [vmem:[#allocation2 + $0x180] sm:$0xff] }
  0x7e   : > { %1029 = vmatpush1.bf16.msra.mxu1 %v1028_v55  ;;  %v221_v55 = vld [vmem:[#allocation2 + $0xa0] sm:$0xff]  ;;  %v251_v21 = vld [vmem:[#allocation2 + $0x190] sm:$0xff]  ;;  %v258_v26 = vld [vmem:[#allocation2 + $0x1c8] sm:$0xff] }
  0x7f   : > { %1077 = vmatpush1.bf16.msra.mxu0 %v1076_v56  ;;  %1030 = vmatprep.subr.bf16.mxu1 %v1366_v0  ;;  %v223_v56 = vld [vmem:[#allocation2 + $0xb0] sm:$0xff]  ;;  %v253_v24 = vld [vmem:[#allocation2 + $0x1a0] sm:$0xff]  ;;  %v260_v27 = vld [vmem:[#allocation2 + $0x1d8] sm:$0xff] }
  0x80   : > { %1078 = vmatprep.subr.bf16.mxu0 %v1366_v0  ;;  %v255_v25 = vld [vmem:[#allocation2 + $0x1b0] sm:$0xff]  ;;  %v262_v30 = vld [vmem:[#allocation2 + $0x1e8] sm:$0xff]  ;;  %v264_v31 = vld [vmem:[#allocation2 + $0x1f8] sm:$0xff] }
  0x81   : > { %v261_v32 = vld [vmem:[#allocation2 + $0x1e0] sm:$0xff]  ;;  %v263_v33 = vld [vmem:[#allocation2 + $0x1f0] sm:$0xff] }
  0x82   : > { %1032 = vmatpush1.bf16.msra.mxu1 %v1031_v61  ;;  %v230_v61 = vld [vmem:[#allocation2 + $0xe8] sm:$0xff] }
  0x83   : > { %1080 = vmatpush1.bf16.msra.mxu0 %v1079_v62  ;;  %1033 = vmatprep.subr.bf16.mxu1 %v1366_v0  ;;  %v232_v62 = vld [vmem:[#allocation2 + $0xf8] sm:$0xff] }
  0x84   : > { %1081 = vmatprep.subr.bf16.mxu0 %v1366_v0 }
  0x86   : > { %1035 = vmatpush1.bf16.msra.mxu1 %v1034_v4  ;;  %v233_v4 = vld [vmem:[#allocation2 + $0x100] sm:$0xff] }
  0x87   : > { %1083 = vmatpush1.bf16.msra.mxu0 %v1082_v5  ;;  %1036 = vmatprep.subr.bf16.mxu1 %v1366_v0  ;;  %v235_v5 = vld [vmem:[#allocation2 + $0x110] sm:$0xff] }
  0x88   : > { %1084 = vmatprep.subr.bf16.mxu0 %v1366_v0 }
  0x8a   : > { %1038 = vmatpush1.bf16.msra.mxu1 %v1037_v10  ;;  %v242_v10 = vld [vmem:[#allocation2 + $0x148] sm:$0xff] }
  0x8b   : > { %1086 = vmatpush1.bf16.msra.mxu0 %v1085_v11  ;;  %1039 = vmatprep.subr.bf16.mxu1 %v1366_v0  ;;  %v244_v11 = vld [vmem:[#allocation2 + $0x158] sm:$0xff] }
  0x8c   : > { %1087 = vmatprep.subr.bf16.mxu0 %v1366_v0 }
  0x8e   : > { %1041 = vmatpush1.bf16.msra.mxu1 %v1040_v16  ;;  %v245_v16 = vld [vmem:[#allocation2 + $0x160] sm:$0xff] }
  0x8f   : > { %1089 = vmatpush1.bf16.msra.mxu0 %v1088_v17  ;;  %1042 = vmatprep.subr.bf16.mxu1 %v1366_v0  ;;  %v247_v17 = vld [vmem:[#allocation2 + $0x170] sm:$0xff] }
  0x90   : > { %1090 = vmatprep.subr.bf16.mxu0 %v1366_v0 }
  0x92   : > { %1044 = vmatpush1.bf16.msra.mxu1 %v1043_v22  ;;  %v254_v22 = vld [vmem:[#allocation2 + $0x1a8] sm:$0xff] }
  0x93   : > { %1092 = vmatpush1.bf16.msra.mxu0 %v1091_v23  ;;  %1045 = vmatprep.subr.bf16.mxu1 %v1366_v0  ;;  %v256_v23 = vld [vmem:[#allocation2 + $0x1b8] sm:$0xff] }
  0x94   : > { %1093 = vmatprep.subr.bf16.mxu0 %v1366_v0 }
  0x96   : > { %1047 = vmatpush1.bf16.msra.mxu1 %v1046_v28  ;;  %v257_v28 = vld [vmem:[#allocation2 + $0x1c0] sm:$0xff] }
  0x97   : > { %1095 = vmatpush1.bf16.msra.mxu0 %v1094_v29  ;;  %1048 = vmatprep.subr.bf16.mxu1 %v1366_v0  ;;  %v259_v29 = vld [vmem:[#allocation2 + $0x1d0] sm:$0xff] }
  0x98   : > { %1096 = vmatprep.subr.bf16.mxu0 %v1366_v0  ;;  %v211_v0 = vld [vmem:[#allocation2 + $0x50] sm:$0xff] }
  0x9a   : > { %1050 = vmatpush1.bf16.msra.mxu1 %v1049_v34  ;;  %v266_v34 = vld [vmem:[#allocation2 + $0x208] sm:$0xff] }
  0x9b   : > { %1098 = vmatpush1.bf16.msra.mxu0 %v1097_v35  ;;  %v268_v35 = vld [vmem:[#allocation2 + $0x218] sm:$0xff] }
  0x9d   : > { %458 = vmatmul.mubr.f32.vlgmr.msra.gmra.mrb[0].mxu1 %v201_v36  ;;  %v265_v36 = vld [vmem:[#allocation2 + $0x200] sm:$0xff] }
  0x9e   : > { %683 = vmatmul.mubr.f32.vlgmr.msra.gmra.mrb[0].mxu0 %v203_v37  ;;  %462 = vmatprep.mubr.f32.mxu1 %v206_v38  ;;  %v267_v37 = vld [vmem:[#allocation2 + $0x210] sm:$0xff]  ;;  %v270_v38 = vld [vmem:[#allocation2 + $0x228] sm:$0xff] }
  0x9f   : > { %687 = vmatprep.mubr.f32.mxu0 %v208_v39  ;;  %v272_v39 = vld [vmem:[#allocation2 + $0x238] sm:$0xff] }
  0xa1   : > { %463 = vmatmul.mubr.f32.gmra.mrb[2].mxu1 %v205_v40  ;;  %v269_v40 = vld [vmem:[#allocation2 + $0x220] sm:$0xff] }
  0xa2   : > { %688 = vmatmul.mubr.f32.gmra.mrb[2].mxu0 %v207_v41  ;;  %467 = vmatprep.mubr.f32.mxu1 %v210_v42  ;;  %v271_v41 = vld [vmem:[#allocation2 + $0x230] sm:$0xff]  ;;  %v274_v42 = vld [vmem:[#allocation2 + $0x248] sm:$0xff] }
  0xa3   : > { %692 = vmatprep.mubr.f32.mxu0 %v212_v43  ;;  %v276_v43 = vld [vmem:[#allocation2 + $0x258] sm:$0xff] }
  0xa5   : > { %468 = vmatmul.mubr.f32.gmra.mrb[4].mxu1 %v209_v44  ;;  %v273_v44 = vld [vmem:[#allocation2 + $0x240] sm:$0xff] }
  0xa6   : > { %693 = vmatmul.mubr.f32.gmra.mrb[4].mxu0 %v211_v0  ;;  %472 = vmatprep.mubr.f32.mxu1 %v214_v45  ;;  %v275_v0 = vld [vmem:[#allocation2 + $0x250] sm:$0xff]  ;;  %v278_v45 = vld [vmem:[#allocation2 + $0x268] sm:$0xff] }
  0xa7   : > { %697 = vmatprep.mubr.f32.mxu0 %v216_v46  ;;  %v280_v46 = vld [vmem:[#allocation2 + $0x278] sm:$0xff] }
  0xa9   : > { %473 = vmatmul.mubr.f32.gmra.mrb[6].mxu1 %v213_v47  ;;  %v277_v47 = vld [vmem:[#allocation2 + $0x260] sm:$0xff] }
  0xaa   : > { %698 = vmatmul.mubr.f32.gmra.mrb[6].mxu0 %v215_v48  ;;  %477 = vmatprep.mubr.f32.mxu1 %v218_v49  ;;  %v279_v48 = vld [vmem:[#allocation2 + $0x270] sm:$0xff]  ;;  %v282_v49 = vld [vmem:[#allocation2 + $0x288] sm:$0xff] }
  0xab   : > { %702 = vmatprep.mubr.f32.mxu0 %v220_v50  ;;  %v284_v50 = vld [vmem:[#allocation2 + $0x298] sm:$0xff] }
  0xad   : > { %478 = vmatmul.mubr.f32.gmra.mrb[8].mxu1 %v217_v51  ;;  %v281_v51 = vld [vmem:[#allocation2 + $0x280] sm:$0xff] }
  0xae   : > { %703 = vmatmul.mubr.f32.gmra.mrb[8].mxu0 %v219_v52  ;;  %482 = vmatprep.mubr.f32.mxu1 %v222_v53  ;;  %v283_v52 = vld [vmem:[#allocation2 + $0x290] sm:$0xff]  ;;  %v286_v53 = vld [vmem:[#allocation2 + $0x2a8] sm:$0xff] }
  0xaf   : > { %707 = vmatprep.mubr.f32.mxu0 %v224_v54  ;;  %v288_v54 = vld [vmem:[#allocation2 + $0x2b8] sm:$0xff] }
  0xb1   : > { %483 = vmatmul.mubr.f32.gmra.mrb[10].mxu1 %v221_v55  ;;  %v285_v55 = vld [vmem:[#allocation2 + $0x2a0] sm:$0xff] }
  0xb2   : > { %708 = vmatmul.mubr.f32.gmra.mrb[10].mxu0 %v223_v56  ;;  %487 = vmatprep.mubr.f32.mxu1 %v226_v57  ;;  %v287_v56 = vld [vmem:[#allocation2 + $0x2b0] sm:$0xff]  ;;  %v290_v57 = vld [vmem:[#allocation2 + $0x2c8] sm:$0xff] }
  0xb3   : > { %712 = vmatprep.mubr.f32.mxu0 %v228_v58  ;;  %v292_v58 = vld [vmem:[#allocation2 + $0x2d8] sm:$0xff] }
  0xb5   : > { %488 = vmatmul.mubr.f32.gmra.mrb[12].mxu1 %v225_v59  ;;  %v289_v59 = vld [vmem:[#allocation2 + $0x2c0] sm:$0xff] }
  0xb6   : > { %713 = vmatmul.mubr.f32.gmra.mrb[12].mxu0 %v227_v60  ;;  %492 = vmatprep.mubr.f32.mxu1 %v230_v61  ;;  %v291_v60 = vld [vmem:[#allocation2 + $0x2d0] sm:$0xff]  ;;  %v294_v61 = vld [vmem:[#allocation2 + $0x2e8] sm:$0xff] }
  0xb7   : > { %717 = vmatprep.mubr.f32.mxu0 %v232_v62  ;;  %v296_v62 = vld [vmem:[#allocation2 + $0x2f8] sm:$0xff] }
  0xb9   : > { %493 = vmatmul.mubr.f32.gmra.mrb[14].mxu1 %v229_v63  ;;  %v293_v63 = vld [vmem:[#allocation2 + $0x2e0] sm:$0xff] }
  0xba   : > { %718 = vmatmul.mubr.f32.gmra.mrb[14].mxu0 %v231_v1  ;;  %497 = vmatprep.mubr.f32.mxu1 %v234_v2  ;;  %v295_v1 = vld [vmem:[#allocation2 + $0x2f0] sm:$0xff]  ;;  %v298_v2 = vld [vmem:[#allocation2 + $0x308] sm:$0xff] }
  0xbb   : > { %722 = vmatprep.mubr.f32.mxu0 %v236_v3  ;;  %v300_v3 = vld [vmem:[#allocation2 + $0x318] sm:$0xff] }
  0xbd   : > { %498 = vmatmul.mubr.f32.gmra.mrb[16].mxu1 %v233_v4  ;;  %v297_v4 = vld [vmem:[#allocation2 + $0x300] sm:$0xff] }
  0xbe   : > { %723 = vmatmul.mubr.f32.gmra.mrb[16].mxu0 %v235_v5  ;;  %502 = vmatprep.mubr.f32.mxu1 %v238_v6  ;;  %v299_v5 = vld [vmem:[#allocation2 + $0x310] sm:$0xff]  ;;  %v302_v6 = vld [vmem:[#allocation2 + $0x328] sm:$0xff] }
  0xbf   : > { %727 = vmatprep.mubr.f32.mxu0 %v240_v7  ;;  %v304_v7 = vld [vmem:[#allocation2 + $0x338] sm:$0xff] }
  0xc1   : > { %503 = vmatmul.mubr.f32.gmra.mrb[18].mxu1 %v237_v8  ;;  %v301_v8 = vld [vmem:[#allocation2 + $0x320] sm:$0xff] }
  0xc2   : > { %728 = vmatmul.mubr.f32.gmra.mrb[18].mxu0 %v239_v9  ;;  %507 = vmatprep.mubr.f32.mxu1 %v242_v10  ;;  %v303_v9 = vld [vmem:[#allocation2 + $0x330] sm:$0xff]  ;;  %v306_v10 = vld [vmem:[#allocation2 + $0x348] sm:$0xff] }
  0xc3   : > { %732 = vmatprep.mubr.f32.mxu0 %v244_v11  ;;  %v308_v11 = vld [vmem:[#allocation2 + $0x358] sm:$0xff] }
  0xc5   : > { %508 = vmatmul.mubr.f32.gmra.mrb[20].mxu1 %v241_v12  ;;  %v305_v12 = vld [vmem:[#allocation2 + $0x340] sm:$0xff] }
  0xc6   : > { %733 = vmatmul.mubr.f32.gmra.mrb[20].mxu0 %v243_v13  ;;  %512 = vmatprep.mubr.f32.mxu1 %v246_v14  ;;  %v307_v13 = vld [vmem:[#allocation2 + $0x350] sm:$0xff]  ;;  %v310_v14 = vld [vmem:[#allocation2 + $0x368] sm:$0xff] }
  0xc7   : > { %737 = vmatprep.mubr.f32.mxu0 %v248_v15  ;;  %v312_v15 = vld [vmem:[#allocation2 + $0x378] sm:$0xff] }
  0xc9   : > { %513 = vmatmul.mubr.f32.gmra.mrb[22].mxu1 %v245_v16  ;;  %v309_v16 = vld [vmem:[#allocation2 + $0x360] sm:$0xff] }
  0xca   : > { %738 = vmatmul.mubr.f32.gmra.mrb[22].mxu0 %v247_v17  ;;  %517 = vmatprep.mubr.f32.mxu1 %v250_v18  ;;  %v311_v17 = vld [vmem:[#allocation2 + $0x370] sm:$0xff]  ;;  %v314_v18 = vld [vmem:[#allocation2 + $0x388] sm:$0xff] }
  0xcb   : > { %742 = vmatprep.mubr.f32.mxu0 %v252_v19  ;;  %v316_v19 = vld [vmem:[#allocation2 + $0x398] sm:$0xff] }
  0xcd   : > { %518 = vmatmul.mubr.f32.gmra.mrb[24].mxu1 %v249_v20  ;;  %v313_v20 = vld [vmem:[#allocation2 + $0x380] sm:$0xff] }
  0xce   : > { %743 = vmatmul.mubr.f32.gmra.mrb[24].mxu0 %v251_v21  ;;  %522 = vmatprep.mubr.f32.mxu1 %v254_v22  ;;  %v315_v21 = vld [vmem:[#allocation2 + $0x390] sm:$0xff]  ;;  %v318_v22 = vld [vmem:[#allocation2 + $0x3a8] sm:$0xff] }
  0xcf   : > { %747 = vmatprep.mubr.f32.mxu0 %v256_v23  ;;  %v320_v23 = vld [vmem:[#allocation2 + $0x3b8] sm:$0xff] }
  0xd1   : > { %523 = vmatmul.mubr.f32.gmra.mrb[26].mxu1 %v253_v24  ;;  %v317_v24 = vld [vmem:[#allocation2 + $0x3a0] sm:$0xff] }
  0xd2   : > { %748 = vmatmul.mubr.f32.gmra.mrb[26].mxu0 %v255_v25  ;;  %527 = vmatprep.mubr.f32.mxu1 %v258_v26  ;;  %v319_v25 = vld [vmem:[#allocation2 + $0x3b0] sm:$0xff]  ;;  %v322_v26 = vld [vmem:[#allocation2 + $0x3c8] sm:$0xff] }
  0xd3   : > { %752 = vmatprep.mubr.f32.mxu0 %v260_v27  ;;  %v324_v27 = vld [vmem:[#allocation2 + $0x3d8] sm:$0xff] }
  0xd5   : > { %528 = vmatmul.mubr.f32.gmra.mrb[28].mxu1 %v257_v28  ;;  %v321_v28 = vld [vmem:[#allocation2 + $0x3c0] sm:$0xff] }
  0xd6   : > { %753 = vmatmul.mubr.f32.gmra.mrb[28].mxu0 %v259_v29  ;;  %532 = vmatprep.mubr.f32.mxu1 %v262_v30  ;;  %v323_v29 = vld [vmem:[#allocation2 + $0x3d0] sm:$0xff]  ;;  %v326_v30 = vld [vmem:[#allocation2 + $0x3e8] sm:$0xff] }
  0xd7   : > { %757 = vmatprep.mubr.f32.mxu0 %v264_v31  ;;  %v328_v31 = vld [vmem:[#allocation2 + $0x3f8] sm:$0xff] }
  0xd9   : > { %533 = vmatmul.mubr.f32.gmra.mrb[30].mxu1 %v261_v32  ;;  %v325_v32 = vld [vmem:[#allocation2 + $0x3e0] sm:$0xff] }
  0xda   : > { %758 = vmatmul.mubr.f32.gmra.mrb[30].mxu0 %v263_v33  ;;  %537 = vmatprep.mubr.f32.mxu1 %v266_v34  ;;  %v327_v33 = vld [vmem:[#allocation2 + $0x3f0] sm:$0xff] }
  0xdb   : > { %762 = vmatprep.mubr.f32.mxu0 %v268_v35 }
  0xdd   : > { %538 = vmatmul.mubr.f32.gmra.mrb[32].mxu1 %v265_v36 }
  0xde   : > { %763 = vmatmul.mubr.f32.gmra.mrb[32].mxu0 %v267_v37  ;;  %542 = vmatprep.mubr.f32.mxu1 %v270_v38 }
  0xdf   : > { %767 = vmatprep.mubr.f32.mxu0 %v272_v39 }
  0xe1   : > { %543 = vmatmul.mubr.f32.gmra.mrb[34].mxu1 %v269_v40 }
  0xe2   : > { %768 = vmatmul.mubr.f32.gmra.mrb[34].mxu0 %v271_v41  ;;  %547 = vmatprep.mubr.f32.mxu1 %v274_v42 }
  0xe3   : > { %772 = vmatprep.mubr.f32.mxu0 %v276_v43 }
  0xe5   : > { %548 = vmatmul.mubr.f32.gmra.mrb[36].mxu1 %v273_v44 }
  0xe6   : > { %773 = vmatmul.mubr.f32.gmra.mrb[36].mxu0 %v275_v0  ;;  %552 = vmatprep.mubr.f32.mxu1 %v278_v45 }
  0xe7   : > { %777 = vmatprep.mubr.f32.mxu0 %v280_v46 }
  0xe9   : > { %553 = vmatmul.mubr.f32.gmra.mrb[38].mxu1 %v277_v47 }
  0xea   : > { %778 = vmatmul.mubr.f32.gmra.mrb[38].mxu0 %v279_v48  ;;  %557 = vmatprep.mubr.f32.mxu1 %v282_v49 }
  0xeb   : > { %782 = vmatprep.mubr.f32.mxu0 %v284_v50 }
  0xed   : > { %558 = vmatmul.mubr.f32.gmra.mrb[40].mxu1 %v281_v51 }
  0xee   : > { %783 = vmatmul.mubr.f32.gmra.mrb[40].mxu0 %v283_v52  ;;  %562 = vmatprep.mubr.f32.mxu1 %v286_v53 }
  0xef   : > { %787 = vmatprep.mubr.f32.mxu0 %v288_v54 }
  0xf1   : > { %563 = vmatmul.mubr.f32.gmra.mrb[42].mxu1 %v285_v55 }
  0xf2   : > { %788 = vmatmul.mubr.f32.gmra.mrb[42].mxu0 %v287_v56  ;;  %567 = vmatprep.mubr.f32.mxu1 %v290_v57 }
  0xf3   : > { %792 = vmatprep.mubr.f32.mxu0 %v292_v58 }
  0xf5   : > { %568 = vmatmul.mubr.f32.gmra.mrb[44].mxu1 %v289_v59 }
  0xf6   : > { %793 = vmatmul.mubr.f32.gmra.mrb[44].mxu0 %v291_v60  ;;  %572 = vmatprep.mubr.f32.mxu1 %v294_v61 }
  0xf7   : > { %797 = vmatprep.mubr.f32.mxu0 %v296_v62 }
  0xf9   : > { %573 = vmatmul.mubr.f32.gmra.mrb[46].mxu1 %v293_v63 }
  0xfa   : > { %798 = vmatmul.mubr.f32.gmra.mrb[46].mxu0 %v295_v1  ;;  %577 = vmatprep.mubr.f32.mxu1 %v298_v2 }
  0xfb   : > { %802 = vmatprep.mubr.f32.mxu0 %v300_v3 }
  0xfd   : > { %578 = vmatmul.mubr.f32.gmra.mrb[48].mxu1 %v297_v4 }
  0xfe   : > { %803 = vmatmul.mubr.f32.gmra.mrb[48].mxu0 %v299_v5  ;;  %582 = vmatprep.mubr.f32.mxu1 %v302_v6 }
  0xff   : > { %807 = vmatprep.mubr.f32.mxu0 %v304_v7 }
 0x101   : > { %583 = vmatmul.mubr.f32.gmra.mrb[50].mxu1 %v301_v8 }
 0x102   : > { %808 = vmatmul.mubr.f32.gmra.mrb[50].mxu0 %v303_v9  ;;  %587 = vmatprep.mubr.f32.mxu1 %v306_v10 }
 0x103   : > { %812 = vmatprep.mubr.f32.mxu0 %v308_v11 }
 0x105   : > { %588 = vmatmul.mubr.f32.gmra.mrb[52].mxu1 %v305_v12 }
 0x106   : > { %813 = vmatmul.mubr.f32.gmra.mrb[52].mxu0 %v307_v13  ;;  %592 = vmatprep.mubr.f32.mxu1 %v310_v14 }
 0x107   : > { %817 = vmatprep.mubr.f32.mxu0 %v312_v15 }
 0x109   : > { %593 = vmatmul.mubr.f32.gmra.mrb[54].mxu1 %v309_v16 }
 0x10a   : > { %818 = vmatmul.mubr.f32.gmra.mrb[54].mxu0 %v311_v17  ;;  %597 = vmatprep.mubr.f32.mxu1 %v314_v18 }
 0x10b   : > { %822 = vmatprep.mubr.f32.mxu0 %v316_v19 }
 0x10d   : > { %598 = vmatmul.mubr.f32.gmra.mrb[56].mxu1 %v313_v20 }
 0x10e   : > { %823 = vmatmul.mubr.f32.gmra.mrb[56].mxu0 %v315_v21  ;;  %602 = vmatprep.mubr.f32.mxu1 %v318_v22 }
 0x10f   : > { %827 = vmatprep.mubr.f32.mxu0 %v320_v23 }
 0x111   : > { %603 = vmatmul.mubr.f32.gmra.mrb[58].mxu1 %v317_v24 }
 0x112   : > { %828 = vmatmul.mubr.f32.gmra.mrb[58].mxu0 %v319_v25  ;;  %607 = vmatprep.mubr.f32.mxu1 %v322_v26 }
 0x113   : > { %832 = vmatprep.mubr.f32.mxu0 %v324_v27 }
 0x115   : > { %608 = vmatmul.mubr.f32.gmra.mrb[60].mxu1 %v321_v28 }
 0x116   : > { %833 = vmatmul.mubr.f32.gmra.mrb[60].mxu0 %v323_v29  ;;  %612 = vmatprep.mubr.f32.mxu1 %v326_v30 }
 0x117   : > { %837 = vmatprep.mubr.f32.mxu0 %v328_v31 }
 0x119   : > { %613 = vmatmul.mubr.f32.gmra.mrb[62].mxu1 %v325_v32 }
 0x11a   : > { %838 = vmatmul.mubr.f32.gmra.mrb[62].mxu0 %v327_v33 }
 0x170   : > { %v459_v34 = vpop.f32.mrb[0].mxu1 }
 0x171   : > { %v684_v35 = vpop.f32.mrb[0].mxu0  ;;  %v461_v36 = vpop.f32.mrb[1].mxu1 }
 0x172   : > { %v685_v37 = vadd.f32 %v684_v35, %v459_v34  ;;  %v686_v38 = vpop.f32.mrb[1].mxu0 }
 0x174   : > { %843 = vst [vmem:[%s1650_s19] sm:$0xff] %v685_v37  ;;  %v464_v39 = vpop.f32.mrb[2].mxu1 }
 0x175   : > { %v689_v40 = vpop.f32.mrb[2].mxu0  ;;  %v466_v41 = vpop.f32.mrb[3].mxu1 }
 0x176   : > { %v690_v42 = vadd.f32 %v689_v40, %v464_v39  ;;  %v691_v43 = vpop.f32.mrb[3].mxu0 }
 0x178   : > { %844 = vst [vmem:[%s1650_s19 + $0x8] sm:$0xff] %v690_v42  ;;  %v469_v44 = vpop.f32.mrb[4].mxu1 }
 0x179   : > { %v694_v0 = vpop.f32.mrb[4].mxu0  ;;  %v471_v45 = vpop.f32.mrb[5].mxu1 }
 0x17a   : > { %v695_v46 = vadd.f32 %v694_v0, %v469_v44  ;;  %v696_v47 = vpop.f32.mrb[5].mxu0 }
 0x17c   : > { %845 = vst [vmem:[%s1650_s19 + $0x10] sm:$0xff] %v695_v46  ;;  %v474_v48 = vpop.f32.mrb[6].mxu1 }
 0x17d   : > { %v699_v49 = vpop.f32.mrb[6].mxu0  ;;  %v476_v50 = vpop.f32.mrb[7].mxu1 }
 0x17e   : > { %v700_v51 = vadd.f32 %v699_v49, %v474_v48  ;;  %v701_v52 = vpop.f32.mrb[7].mxu0 }
 0x180   : > { %846 = vst [vmem:[%s1650_s19 + $0x18] sm:$0xff] %v700_v51  ;;  %v479_v53 = vpop.f32.mrb[8].mxu1 }
 0x181   : > { %v704_v54 = vpop.f32.mrb[8].mxu0  ;;  %v481_v55 = vpop.f32.mrb[9].mxu1 }
 0x182   : > { %v705_v56 = vadd.f32 %v704_v54, %v479_v53  ;;  %v706_v57 = vpop.f32.mrb[9].mxu0 }
 0x184   : > { %847 = vst [vmem:[%s1650_s19 + $0x20] sm:$0xff] %v705_v56  ;;  %v484_v58 = vpop.f32.mrb[10].mxu1 }
 0x185   : > { %v709_v59 = vpop.f32.mrb[10].mxu0  ;;  %v486_v60 = vpop.f32.mrb[11].mxu1 }
 0x186   : > { %v710_v61 = vadd.f32 %v709_v59, %v484_v58  ;;  %v711_v62 = vpop.f32.mrb[11].mxu0 }
 0x188   : > { %848 = vst [vmem:[%s1650_s19 + $0x28] sm:$0xff] %v710_v61  ;;  %v489_v63 = vpop.f32.mrb[12].mxu1 }
 0x189   : > { %v714_v1 = vpop.f32.mrb[12].mxu0  ;;  %v491_v2 = vpop.f32.mrb[13].mxu1 }
 0x18a   : > { %v715_v3 = vadd.f32 %v714_v1, %v489_v63  ;;  %v716_v4 = vpop.f32.mrb[13].mxu0 }
 0x18c   : > { %849 = vst [vmem:[%s1650_s19 + $0x30] sm:$0xff] %v715_v3  ;;  %v494_v5 = vpop.f32.mrb[14].mxu1 }
 0x18d   : > { %v719_v6 = vpop.f32.mrb[14].mxu0  ;;  %v496_v7 = vpop.f32.mrb[15].mxu1 }
 0x18e   : > { %v720_v8 = vadd.f32 %v719_v6, %v494_v5  ;;  %v721_v9 = vpop.f32.mrb[15].mxu0 }
 0x190   : > { %850 = vst [vmem:[%s1650_s19 + $0x38] sm:$0xff] %v720_v8  ;;  %v499_v10 = vpop.f32.mrb[16].mxu1 }
 0x191   : > { %v724_v11 = vpop.f32.mrb[16].mxu0  ;;  %v501_v12 = vpop.f32.mrb[17].mxu1 }
 0x192   : > { %v725_v13 = vadd.f32 %v724_v11, %v499_v10  ;;  %v726_v14 = vpop.f32.mrb[17].mxu0 }
 0x194   : > { %851 = vst [vmem:[%s1650_s19 + $0x40] sm:$0xff] %v725_v13  ;;  %v504_v15 = vpop.f32.mrb[18].mxu1 }
 0x195   : > { %v729_v16 = vpop.f32.mrb[18].mxu0  ;;  %v506_v17 = vpop.f32.mrb[19].mxu1 }
 0x196   : > { %v730_v18 = vadd.f32 %v729_v16, %v504_v15  ;;  %v731_v19 = vpop.f32.mrb[19].mxu0 }
 0x198   : > { %852 = vst [vmem:[%s1650_s19 + $0x48] sm:$0xff] %v730_v18  ;;  %v509_v20 = vpop.f32.mrb[20].mxu1 }
 0x199   : > { %v734_v21 = vpop.f32.mrb[20].mxu0  ;;  %v511_v22 = vpop.f32.mrb[21].mxu1 }
 0x19a   : > { %v735_v23 = vadd.f32 %v734_v21, %v509_v20  ;;  %v736_v24 = vpop.f32.mrb[21].mxu0 }
 0x19c   : > { %853 = vst [vmem:[%s1650_s19 + $0x50] sm:$0xff] %v735_v23  ;;  %v514_v25 = vpop.f32.mrb[22].mxu1 }
 0x19d   : > { %v739_v26 = vpop.f32.mrb[22].mxu0  ;;  %v516_v27 = vpop.f32.mrb[23].mxu1 }
 0x19e   : > { %v740_v28 = vadd.f32 %v739_v26, %v514_v25  ;;  %v741_v29 = vpop.f32.mrb[23].mxu0 }
 0x1a0   : > { %854 = vst [vmem:[%s1650_s19 + $0x58] sm:$0xff] %v740_v28  ;;  %v519_v30 = vpop.f32.mrb[24].mxu1 }
 0x1a1   : > { %v744_v31 = vpop.f32.mrb[24].mxu0  ;;  %v521_v32 = vpop.f32.mrb[25].mxu1 }
 0x1a2   : > { %v745_v33 = vadd.f32 %v744_v31, %v519_v30  ;;  %v746_v34 = vpop.f32.mrb[25].mxu0 }
 0x1a4   : > { %855 = vst [vmem:[%s1650_s19 + $0x60] sm:$0xff] %v745_v33  ;;  %v524_v35 = vpop.f32.mrb[26].mxu1 }
 0x1a5   : > { %v749_v36 = vpop.f32.mrb[26].mxu0  ;;  %v526_v37 = vpop.f32.mrb[27].mxu1 }
 0x1a6   : > { %v750_v38 = vadd.f32 %v749_v36, %v524_v35  ;;  %v751_v39 = vpop.f32.mrb[27].mxu0 }
 0x1a8   : > { %856 = vst [vmem:[%s1650_s19 + $0x68] sm:$0xff] %v750_v38  ;;  %v529_v40 = vpop.f32.mrb[28].mxu1 }
 0x1a9   : > { %v754_v41 = vpop.f32.mrb[28].mxu0  ;;  %v531_v42 = vpop.f32.mrb[29].mxu1 }
 0x1aa   : > { %v755_v43 = vadd.f32 %v754_v41, %v529_v40  ;;  %v756_v44 = vpop.f32.mrb[29].mxu0 }
 0x1ac   : > { %857 = vst [vmem:[%s1650_s19 + $0x70] sm:$0xff] %v755_v43  ;;  %v534_v0 = vpop.f32.mrb[30].mxu1 }
 0x1ad   : > { %v759_v45 = vpop.f32.mrb[30].mxu0  ;;  %v536_v46 = vpop.f32.mrb[31].mxu1 }
 0x1ae   : > { %v760_v47 = vadd.f32 %v759_v45, %v534_v0  ;;  %v761_v48 = vpop.f32.mrb[31].mxu0 }
 0x1b0   : > { %858 = vst [vmem:[%s1650_s19 + $0x78] sm:$0xff] %v760_v47  ;;  %v539_v49 = vpop.f32.mrb[32].mxu1 }
 0x1b1   : > { %v764_v50 = vpop.f32.mrb[32].mxu0  ;;  %v541_v51 = vpop.f32.mrb[33].mxu1 }
 0x1b2   : > { %v765_v52 = vadd.f32 %v764_v50, %v539_v49  ;;  %v766_v53 = vpop.f32.mrb[33].mxu0 }
 0x1b4   : > { %859 = vst [vmem:[%s1650_s19 + $0x80] sm:$0xff] %v765_v52  ;;  %v544_v54 = vpop.f32.mrb[34].mxu1 }
 0x1b5   : > { %v769_v55 = vpop.f32.mrb[34].mxu0  ;;  %v546_v56 = vpop.f32.mrb[35].mxu1 }
 0x1b6   : > { %v770_v57 = vadd.f32 %v769_v55, %v544_v54  ;;  %v771_v58 = vpop.f32.mrb[35].mxu0 }
 0x1b8   : > { %860 = vst [vmem:[%s1650_s19 + $0x88] sm:$0xff] %v770_v57  ;;  %v549_v59 = vpop.f32.mrb[36].mxu1 }
 0x1b9   : > { %v774_v60 = vpop.f32.mrb[36].mxu0  ;;  %v551_v61 = vpop.f32.mrb[37].mxu1 }
 0x1ba   : > { %v775_v62 = vadd.f32 %v774_v60, %v549_v59  ;;  %v776_v63 = vpop.f32.mrb[37].mxu0 }
 0x1bc   : > { %861 = vst [vmem:[%s1650_s19 + $0x90] sm:$0xff] %v775_v62  ;;  %v554_v1 = vpop.f32.mrb[38].mxu1 }
 0x1bd   : > { %v779_v2 = vpop.f32.mrb[38].mxu0  ;;  %v556_v3 = vpop.f32.mrb[39].mxu1 }
 0x1be   : > { %v780_v4 = vadd.f32 %v779_v2, %v554_v1  ;;  %v781_v5 = vpop.f32.mrb[39].mxu0 }
 0x1c0   : > { %862 = vst [vmem:[%s1650_s19 + $0x98] sm:$0xff] %v780_v4  ;;  %v559_v6 = vpop.f32.mrb[40].mxu1 }
 0x1c1   : > { %v784_v7 = vpop.f32.mrb[40].mxu0  ;;  %v561_v8 = vpop.f32.mrb[41].mxu1 }
 0x1c2   : > { %v785_v9 = vadd.f32 %v784_v7, %v559_v6  ;;  %v786_v10 = vpop.f32.mrb[41].mxu0 }
 0x1c4   : > { %863 = vst [vmem:[%s1650_s19 + $0xa0] sm:$0xff] %v785_v9  ;;  %v564_v11 = vpop.f32.mrb[42].mxu1 }
 0x1c5   : > { %v789_v12 = vpop.f32.mrb[42].mxu0  ;;  %v566_v13 = vpop.f32.mrb[43].mxu1 }
 0x1c6   : > { %v790_v14 = vadd.f32 %v789_v12, %v564_v11  ;;  %v791_v15 = vpop.f32.mrb[43].mxu0 }
 0x1c8   : > { %864 = vst [vmem:[%s1650_s19 + $0xa8] sm:$0xff] %v790_v14  ;;  %v569_v16 = vpop.f32.mrb[44].mxu1 }
 0x1c9   : > { %v794_v17 = vpop.f32.mrb[44].mxu0  ;;  %v571_v18 = vpop.f32.mrb[45].mxu1 }
 0x1ca   : > { %v795_v19 = vadd.f32 %v794_v17, %v569_v16  ;;  %v796_v20 = vpop.f32.mrb[45].mxu0 }
 0x1cc   : > { %865 = vst [vmem:[%s1650_s19 + $0xb0] sm:$0xff] %v795_v19  ;;  %v574_v21 = vpop.f32.mrb[46].mxu1 }
 0x1cd   : > { %v799_v22 = vpop.f32.mrb[46].mxu0  ;;  %v576_v23 = vpop.f32.mrb[47].mxu1 }
 0x1ce   : > { %v800_v24 = vadd.f32 %v799_v22, %v574_v21  ;;  %v801_v25 = vpop.f32.mrb[47].mxu0 }
 0x1d0   : > { %866 = vst [vmem:[%s1650_s19 + $0xb8] sm:$0xff] %v800_v24  ;;  %v579_v26 = vpop.f32.mrb[48].mxu1 }
 0x1d1   : > { %v804_v27 = vpop.f32.mrb[48].mxu0  ;;  %v581_v28 = vpop.f32.mrb[49].mxu1 }
 0x1d2   : > { %v805_v29 = vadd.f32 %v804_v27, %v579_v26  ;;  %v806_v30 = vpop.f32.mrb[49].mxu0 }
 0x1d4   : > { %867 = vst [vmem:[%s1650_s19 + $0xc0] sm:$0xff] %v805_v29  ;;  %v584_v31 = vpop.f32.mrb[50].mxu1 }
 0x1d5   : > { %v809_v32 = vpop.f32.mrb[50].mxu0  ;;  %v586_v33 = vpop.f32.mrb[51].mxu1 }
 0x1d6   : > { %v810_v34 = vadd.f32 %v809_v32, %v584_v31  ;;  %v811_v35 = vpop.f32.mrb[51].mxu0 }
 0x1d8   : > { %868 = vst [vmem:[%s1650_s19 + $0xc8] sm:$0xff] %v810_v34  ;;  %v589_v36 = vpop.f32.mrb[52].mxu1 }
 0x1d9   : > { %v814_v37 = vpop.f32.mrb[52].mxu0  ;;  %v591_v38 = vpop.f32.mrb[53].mxu1 }
 0x1da   : > { %v815_v39 = vadd.f32 %v814_v37, %v589_v36  ;;  %v816_v40 = vpop.f32.mrb[53].mxu0 }
 0x1dc   : > { %869 = vst [vmem:[%s1650_s19 + $0xd0] sm:$0xff] %v815_v39  ;;  %v594_v41 = vpop.f32.mrb[54].mxu1 }
 0x1dd   : > { %v819_v42 = vpop.f32.mrb[54].mxu0  ;;  %v596_v43 = vpop.f32.mrb[55].mxu1 }
 0x1de   : > { %v820_v44 = vadd.f32 %v819_v42, %v594_v41  ;;  %v821_v0 = vpop.f32.mrb[55].mxu0 }
 0x1e0   : > { %870 = vst [vmem:[%s1650_s19 + $0xd8] sm:$0xff] %v820_v44  ;;  %v599_v45 = vpop.f32.mrb[56].mxu1 }
 0x1e1   : > { %v824_v46 = vpop.f32.mrb[56].mxu0  ;;  %v601_v47 = vpop.f32.mrb[57].mxu1 }
 0x1e2   : > { %v825_v48 = vadd.f32 %v824_v46, %v599_v45  ;;  %v826_v49 = vpop.f32.mrb[57].mxu0 }
 0x1e4   : > { %871 = vst [vmem:[%s1650_s19 + $0xe0] sm:$0xff] %v825_v48  ;;  %v604_v50 = vpop.f32.mrb[58].mxu1 }
 0x1e5   : > { %v829_v51 = vpop.f32.mrb[58].mxu0  ;;  %v606_v52 = vpop.f32.mrb[59].mxu1 }
 0x1e6   : > { %v830_v53 = vadd.f32 %v829_v51, %v604_v50  ;;  %v831_v54 = vpop.f32.mrb[59].mxu0 }
 0x1e8   : > { %872 = vst [vmem:[%s1650_s19 + $0xe8] sm:$0xff] %v830_v53  ;;  %v609_v55 = vpop.f32.mrb[60].mxu1 }
 0x1e9   : > { %v834_v56 = vpop.f32.mrb[60].mxu0  ;;  %v611_v57 = vpop.f32.mrb[61].mxu1 }
 0x1ea   : > { %v835_v58 = vadd.f32 %v834_v56, %v609_v55  ;;  %v836_v59 = vpop.f32.mrb[61].mxu0 }
 0x1ec   : > { %873 = vst [vmem:[%s1650_s19 + $0xf0] sm:$0xff] %v835_v58  ;;  %v614_v60 = vpop.f32.mrb[62].mxu1 }
 0x1ed   : > { %v839_v61 = vpop.f32.mrb[62].mxu0  ;;  %v616_v62 = vpop.f32.mrb[63].mxu1 }
 0x1ee   : > { %v840_v63 = vadd.f32 %v839_v61, %v614_v60  ;;  %v841_v1 = vpop.f32.mrb[63].mxu0 }
 0x1f0   : > { %874 = vst [vmem:[%s1650_s19 + $0xf8] sm:$0xff] %v840_v63 }
 0x1f1   : > { %1284 = shalt.err (!%p1281_p6)
}
 0x1f2   : > { %s1285_s24 = scalar_lea.hbm %s1688_s8, 4096  ;;  %s1289_s30 = scalar_lea.hbm %s1742_s2, 8192 }
 0x1f3   : > { %p1286_p0 = scmp.ne.s32.totalorder %s1688_s8, %s1285_s24  ;;  %p1290_p12 = scmp.lt.u32.totalorder %s1688_s8, %s1742_s2 }
 0x1f4   : > { %p1291_p5 = scmp.lt.u32.totalorder %s1289_s30, %s1285_s24  ;;  %p1293_p9 = scmp.lt.u32.totalorder %s1285_s24, %s1688_s8 }
 0x1f5   : > { %p1287_p2 = pnand %p1286_p0, %p1761_p11 }
 0x1f6   : > { %p1292_p8 = por %p1291_p5, %p1290_p12 }
 0x1f7   : > { %p1288_p7 = pneg %p1287_p2 }
 0x1f8   : > { %p1294_p13 = por %p1293_p9, %p1292_p8 }
 0x1fa   : > { %p1295_p4 = pnand %p1294_p13, %p1288_p7 }
 0x1fc   : > { %1298 = shalt.err (!%p1295_p4)
}
 0x1fd   : > { %s1368_s17 = smov 128   ;;  %s1369_s19 = smov 256  }
 0x1fe   : > { %s1370_s22 = smov 8  }
 0x1ff   : > { %1137 = dma.vmem_to_hbm [thread:$0]  (%p1761_p11), %s1690_s26, 4096, %s1688_s8, %s876_s12, %s1368_s17, %s1369_s19, %s1370_s22  }
 0x200 PF: > { %s906_s25 = sand.u32 1, %s1337_s9   ;;  %p1762_p1 = scmp.ne.s32.totalorder %s1753_s21, 0 }
 0x201   : > { %p1763_p10 = scmp.ge.s32.totalorder %s1357_s14, 2  ;;  %s907_s6 = scalar_lea.sflag [#allocation4], %s906_s25 }
 0x203   : > { %p1148_p3 = pnand %p1763_p10, %p1762_p1 }
 0x205   : > { %1332 = dma.done.wait (!%p1148_p3), %s907_s6, 4096  }
 0x206   : > { %1334 = vsyncadd (!%p1148_p3), %s907_s6, 4294963200  ;;  %s19_s14 = sadd.s32 1, %s1357_s14   ;;  %s1764_s9 = smov %s1341_s10 }
 0x207   : > { %p16_p6 = scmp.ge.s32.totalorder %s19_s14, 4   ;;  %s1765_s10 = smov %s1345_s11 }
 0x208   : > { %s1766_s11 = smov %s1504_s7  ;;  %s1767_s12 = smov %s1353_s13 }
 0x209   : > { %s1768_s13 = smov %s1770_s27  ;;  %18 = sbr.rel (!%p16_p6) target bundleno = 7 (0x7), region = 79 }
 0x210   :  { %912 = vsyncpa [#allocation3], 1 }
 0x211   :  { %914 = vsyncpa [#allocation3 + $0x1], 1 }
 0x212   :  { %915 = vsyncpa [#allocation6], 1 }
 0x213   :  { %917 = vsyncpa [#allocation6 + $0x1], 1 }
 0x214   :  { %918 = vsyncpa [#allocation4], 1 }
 0x215   :  { %920 = vsyncpa [#allocation4 + $0x1], 1 }

</bundles_post_ra>
